<compile_context>
chip_gen: v6e
topology: v6e:2x2x1
jax: 0.10.0
libtpu: 0.0.40
codegen_flags: <defaults>
</compile_context>

<pallas_src>
import jax
import jax.numpy as jnp
from jax import lax
from jax.experimental import pallas as pl
from jax.experimental.pallas import tpu as pltpu


def _mlp_kernel(x_ref, w1T_ref, b1w2_ref, b2_ref, o_ref):
    # x_ref   : (tile_b, F)  natural layout -- batch on sublanes, features on lanes
    # w1T_ref : (H, F)       resident
    # b1w2_ref: (H, 2)       column 0 = b1, column 1 = w2 (resident)
    # b2_ref  : (1,)         SMEM scalar
    # o_ref   : (1, tile_b)  lane-dense output slab
    #
    # fc1 on the MXU, contracting the feature dim (last dim of BOTH operands,
    # i.e. the q @ k^T pattern) so the result lands batch-on-lanes:
    #   hT(H, tile_b) = W1^T(H, F) . x(tile_b, F)^T
    hT = lax.dot_general(
        w1T_ref[...], x_ref[...],
        dimension_numbers=(((1,), (1,)), ((), ())),
        preferred_element_type=jnp.float32,
    )
    b1 = b1w2_ref[:, 0:1]                       # (H, 1)
    w2 = b1w2_ref[:, 1:2]                       # (H, 1)
    hT = jnp.maximum(hT + b1, 0.0)              # bias broadcast over lanes + ReLU
    # fc2 off the MXU: VPU multiply + sublane reduce (cheap; output stays lane-dense).
    logits = jnp.sum(hT * w2, axis=0, keepdims=True) + b2_ref[0]   # (1, tile_b)
    o_ref[...] = jax.nn.sigmoid(logits).astype(o_ref.dtype)


def credit_card_mlp_forward(x, w1, b1, w2, b2, *, tile_b=8192):
    """Forward pass: sigmoid(relu(x @ w1 + b1) @ w2 + b2).

    x  : (B, 29) float32   (natural PyTorch layout; DMA'd as-is, no transpose/pad)
    w1 : (29, H) float32   (transpose of PyTorch fc1.weight)
    b1 : (H,) or (1, H)
    w2 : (H, 1)  float32   (transpose of PyTorch fc2.weight)
    b2 : (1,) or (1, 1)
    returns (B, 1) float32
    """
    x = jnp.asarray(x, jnp.float32)
    B, F = x.shape
    H = w1.shape[1]

    # Tiny, one-time parameter re-layouts (weights only; x is untouched).
    w1T = jnp.asarray(w1, jnp.float32).T                                  # (H, F)
    b1c = jnp.reshape(jnp.asarray(b1, jnp.float32), (H, 1))
    w2c = jnp.reshape(jnp.asarray(w2, jnp.float32), (H, 1))
    b1w2 = jnp.concatenate([b1c, w2c], axis=1)                            # (H, 2)
    b2c = jnp.reshape(jnp.asarray(b2, jnp.float32), (1,))

    # --- batch tiling ------------------------------------------------------
    # Lane-aligned tile (multiple of 128); default 8192 amortizes per-step
    # grid overhead and keeps VMEM use at a few MiB (fits every generation).
    b_ceil = ((B + 127) // 128) * 128
    tile_b = max(128, min(int(tile_b), b_ceil))
    tile_b = (tile_b // 128) * 128
    # Guarantee >=2 grid steps when possible so megacore (v7x) can shard.
    if pl.cdiv(b_ceil, tile_b) < 2 and b_ceil >= 256:
        tile_b = ((pl.cdiv(b_ceil, 2) + 127) // 128) * 128
    grid = (pl.cdiv(B, tile_b),)

    out = pl.pallas_call(
        _mlp_kernel,
        out_shape=jax.ShapeDtypeStruct((1, B), jnp.float32),
        grid=grid,
        in_specs=[
            # x: natural (tile_b, 29) blocks, batch-tiled; edge block is partial.
            pl.BlockSpec((tile_b, F), lambda i: (i, 0)),
            # W1^T and [b1 | w2]: resident in VMEM across the whole grid.
            pl.BlockSpec((H, F), lambda i: (0, 0)),
            pl.BlockSpec((H, 2), lambda i: (0, 0)),
            # b2: single scalar, lives in SMEM.
            pl.BlockSpec(memory_space=pltpu.MemorySpace.SMEM),
        ],
        out_specs=pl.BlockSpec((1, tile_b), lambda i: (0, i)),
        compiler_params=pltpu.CompilerParams(
            # Batch tiles are independent -> shard across TCs on v7x megacore.
            dimension_semantics=("parallel",),
            # Plenty of headroom for tiles up to ~32K on every generation.
            vmem_limit_bytes=32 * 1024 * 1024,
        ),
    )(x, w1T, b1w2, b2c)

    # Restore the (B, 1) PyTorch output shape.
    return out[0, :].reshape(B, 1)


def init_params(key, input_size=29, hidden_size=32, output_size=1):
    """Deterministic init mimicking nn.Linear's uniform(-1/sqrt(fan_in), 1/sqrt(fan_in))."""
    k1, k2, k3, k4 = jax.random.split(key, 4)
    bound1 = 1.0 / jnp.sqrt(jnp.float32(input_size))
    bound2 = 1.0 / jnp.sqrt(jnp.float32(hidden_size))
    w1 = jax.random.uniform(k1, (input_size, hidden_size), jnp.float32, -bound1, bound1)
    b1 = jax.random.uniform(k2, (1, hidden_size), jnp.float32, -bound1, bound1)
    w2 = jax.random.uniform(k3, (hidden_size, output_size), jnp.float32, -bound2, bound2)
    b2 = jax.random.uniform(k4, (1, output_size), jnp.float32, -bound2, bound2)
    return w1, b1, w2, b2


def _reference(x, w1, b1, w2, b2):
    h = jnp.maximum(x @ w1 + b1, 0.0)
    return jax.nn.sigmoid(h @ w2 + b2)


if __name__ == "__main__":
    key = jax.random.PRNGKey(0)
    k_x, k_x2, k_p = jax.random.split(key, 3)

    input_size = 29
    hidden_size = 32
    w1, b1, w2, b2 = init_params(k_p, input_size, hidden_size, 1)

    # Small batch (typical inference usage of the PyTorch module).
    batch = 8
    x = jax.random.normal(k_x, (batch, input_size), jnp.float32)
    out = jax.block_until_ready(credit_card_mlp_forward(x, w1, b1, w2, b2))
    ref = _reference(x, w1, b1, w2, b2)
    assert out.shape == (batch, 1)
    # Tolerance accounts for MXU matmul pass-decomposition vs XLA default precision.
    assert jnp.allclose(out, ref, atol=1e-3), "mismatch vs reference (batch=8)"

    # Non-multiple batch to exercise the partial-edge-block / multi-tile path.
    batch2 = 200
    x2 = jax.random.normal(k_x2, (batch2, input_size), jnp.float32)
    out2 = jax.block_until_ready(credit_card_mlp_forward(x2, w1, b1, w2, b2))
    ref2 = _reference(x2, w1, b1, w2, b2)
    assert out2.shape == (batch2, 1)
    assert jnp.allclose(out2, ref2, atol=1e-3), "mismatch vs reference (batch=200)"

    # NOTE: for truly tiny batches this whole forward is cheaper left to XLA
    # fusion; the Pallas kernel pays off once batch is large (HBM-bound).
    print("KERNEL_OK")
</pallas_src>

<mosaic_0001>
module attributes {stable_mosaic.version = 11 : i64} {
  func.func @_mlp_kernel(%arg0: i32, %arg1: memref<128x29xf32, #tpu.memory_space<vmem>>, %arg2: memref<32x29xf32, #tpu.memory_space<vmem>>, %arg3: memref<32x2xf32, #tpu.memory_space<vmem>>, %arg4: memref<1xf32, #tpu.memory_space<smem>>, %arg5: memref<1x128xf32, #tpu.memory_space<vmem>>) attributes {dimension_semantics = [#tpu.dimension_semantics<parallel>], iteration_bounds = array<i64: 1>, scalar_prefetch = 0 : i64, scratch_operands = 0 : i64, tpu.core_type = #tpu.core_type<tc>, window_params = [{transform_indices = @transform_0, window_bounds = array<i64: 128, 29>}, {pipeline_mode = #tpu.pipeline_mode<synchronous>, transform_indices = @transform_1, window_bounds = array<i64: 32, 29>}, {pipeline_mode = #tpu.pipeline_mode<synchronous>, transform_indices = @transform_2, window_bounds = array<i64: 32, 2>}, {transform_indices = @transform_3, window_bounds = array<i64: 1>}, {transform_indices = @transform_4, window_bounds = array<i64: 1, 128>}]} {
    %c0 = arith.constant 0 : index
    %c0_0 = arith.constant 0 : index
    %0 = vector.load %arg2[%c0, %c0_0] : memref<32x29xf32, #tpu.memory_space<vmem>>, vector<32x29xf32>
    %c0_1 = arith.constant 0 : index
    %c0_2 = arith.constant 0 : index
    %1 = vector.load %arg1[%c0_1, %c0_2] : memref<128x29xf32, #tpu.memory_space<vmem>>, vector<128x29xf32>
    %cst = arith.constant dense<0.000000e+00> : vector<32x128xf32>
    %2 = tpu.matmul %0, %1, %cst {dimension_numbers = #tpu.dot_dimension_numbers<[1], [1], [0], [0], [0, 0, 1, 0], [], []>} : vector<32x29xf32>, vector<128x29xf32>, vector<32x128xf32> -> vector<32x128xf32>
    %c0_3 = arith.constant 0 : index
    %c0_4 = arith.constant 0 : index
    %3 = vector.load %arg3[%c0_3, %c0_4] : memref<32x2xf32, #tpu.memory_space<vmem>>, vector<32x1xf32>
    %c0_5 = arith.constant 0 : index
    %c1 = arith.constant 1 : index
    %4 = vector.load %arg3[%c0_5, %c1] : memref<32x2xf32, #tpu.memory_space<vmem>>, vector<32x1xf32>
    %5 = vector.broadcast %3 : vector<32x1xf32> to vector<32x128xf32>
    %6 = arith.addf %2, %5 : vector<32x128xf32>
    %cst_6 = arith.constant 0.000000e+00 : f32
    %7 = vector.broadcast %cst_6 : f32 to vector<32x128xf32>
    %8 = arith.maximumf %6, %7 : vector<32x128xf32>
    %9 = vector.broadcast %4 : vector<32x1xf32> to vector<32x128xf32>
    %10 = arith.mulf %8, %9 : vector<32x128xf32>
    %cst_7 = arith.constant dense<0.000000e+00> : vector<128xf32>
    %11 = vector.multi_reduction <add>, %10, %cst_7 [0] : vector<32x128xf32> to vector<128xf32>
    %12 = vector.shape_cast %11 : vector<128xf32> to vector<1x128xf32>
    %c0_8 = arith.constant 0 : index
    %13 = memref.load %arg4[%c0_8] : memref<1xf32, #tpu.memory_space<smem>>
    %14 = vector.broadcast %13 : f32 to vector<1x128xf32>
    %15 = arith.addf %12, %14 : vector<1x128xf32>
    %16 = arith.negf %15 : vector<1x128xf32>
    %17 = math.exp %16 : vector<1x128xf32>
    %cst_9 = arith.constant 1.000000e+00 : f32
    %18 = vector.broadcast %cst_9 : f32 to vector<1x128xf32>
    %19 = arith.addf %18, %17 : vector<1x128xf32>
    %20 = arith.divf %18, %19 : vector<1x128xf32>
    %c0_10 = arith.constant 0 : index
    %c0_11 = arith.constant 0 : index
    %21 = vector.load %arg5[%c0_10, %c0_11] : memref<1x128xf32, #tpu.memory_space<vmem>>, vector<1x128xf32>
    tpu.vector_store %arg5[%c0_10, %c0_11], %20 {strides = array<i32>} : memref<1x128xf32, #tpu.memory_space<vmem>>, vector<1x128xf32>,
    return
  }
  func.func @transform_0(%arg0: i32) -> (i32, i32) {
    %c0_i32 = arith.constant 0 : i32
    %c0_i32_0 = arith.constant 0 : i32
    return %arg0, %c0_i32 : i32, i32
  }
  func.func @transform_1(%arg0: i32) -> (i32, i32) {
    %c0_i32 = arith.constant 0 : i32
    %c0_i32_0 = arith.constant 0 : i32
    %c0_i32_1 = arith.constant 0 : i32
    return %c0_i32, %c0_i32_0 : i32, i32
  }
  func.func @transform_2(%arg0: i32) -> (i32, i32) {
    %c0_i32 = arith.constant 0 : i32
    %c0_i32_0 = arith.constant 0 : i32
    %c0_i32_1 = arith.constant 0 : i32
    return %c0_i32, %c0_i32_0 : i32, i32
  }
  func.func @transform_3(%arg0: i32) -> i32 {
    %c0_i32 = arith.constant 0 : i32
    %c0_i32_0 = arith.constant 0 : i32
    return %c0_i32 : i32
  }
  func.func @transform_4(%arg0: i32) -> (i32, i32) {
    %c0_i32 = arith.constant 0 : i32
    %c0_i32_0 = arith.constant 0 : i32
    return %c0_i32, %arg0 : i32, i32
  }
}

</mosaic_0001>

<bundles_post_ra>
// kernel: tpu_custom_call.1
= control target key start
LH: loop header
LB: loop body
LE: loop exit
PB: predicated region body
PF: predicated region fallthrough
CT: control target
= control target key end

     0   :  { %10 = vsyncpa [#allocation4], 0  ;;  %s582_s0 = inlined_call_operand.hbm [shape: f32[8,29], index: 0, kind: input, shape index: {}]   ;;  %s583_s1 = inlined_call_operand.vmem [shape: f32[32,29], index: 1, kind: input, shape index: {}]   ;;  %s584_s2 = inlined_call_operand.vmem [shape: f32[32,2], index: 2, kind: input, shape index: {}]   ;;  %s585_s3 = inlined_call_operand.<no memory space> [shape: f32[1], index: 3, kind: input, shape index: {}]   ;;  %s586_s4 = inlined_call_operand.hbm [shape: f32[1,8], index: 4, kind: output, shape index: {}]  }
   0x1   :  { %11 = vsyncpa [#allocation5], 0 }
   0x2   :  { %16 = vsyncadd [#allocation4], 1920  ;;  %s450_s15 = smov [#allocation3]  }
   0x3   :  { %s17_s16 = sshll.u32 %s450_s15, 4  ;;  %s18_s16 = int_to_ptr.vmem [resolvable:$true] %s17_s16 }
   0x4   :  { %s414_s17 = scalar_lea.vmem %s18_s16, 128  ;;  %s418_s18 = scalar_lea.vmem %s18_s16, 2048 }
   0x5   :  { %p415_p0 = scmp.ne.s32.totalorder %s18_s16, %s414_s17  ;;  %p419_p1 = scmp.lt.s32.totalorder %s18_s16, %s18_s16 }
   0x6   :  { %p420_p2 = scmp.lt.s32.totalorder %s418_s18, %s414_s17 }
   0x8   :  { %p421_p3 = por %p420_p2, %p419_p1 }
   0xa   :  { %p422_p4 = pnand %p421_p3, %p415_p0 }
   0xc   :  { %425 = shalt.err (!%p422_p4)
}
   0xd   :  { %s451_s19 = smov 128   ;;  %s452_s20 = smov 8  }
   0xe   :  { %23 = dma.hbm_to_vmem [thread:$0]  %s582_s0, 128, %s18_s16, [#allocation4], %s451_s19, %s451_s19, %s452_s20  }
   0xf   :  { %446 = dma.done.wait [#allocation4], 2048  }
  0x10   :  { %447 = vsyncadd [#allocation4], 4294965248  ;;  %v453_v0 = vmov 0   ;;  %vm77_vm0 = vcmask 236544   ;;  %v52_v1 = vld [vmem:[#allocation3 + $0x78] sm:$0xff]  ;;  %v51_v2 = vld [vmem:[#allocation3 + $0x70] sm:$0xff]  ;;  %v257_v58 = vstv %s585_s3 }
  0x11   :  { %399 = vset.pattern.permute.xlu1 %v453_v0  ;;  %398 = vset.pattern.permute.xlu0 %v453_v0  ;;  %v50_v3 = vld [vmem:[#allocation3 + $0x68] sm:$0xff]  ;;  %v33_v4 = vld [vmem:[%s583_s1] sm:$0xff]  ;;  %v35_v5 = vld [vmem:[%s583_s1 + $0x10] sm:$0xff]  ;;  %v454_v13 = vmov 1   ;;  %s455_s12 = smov [#allocation6]  }
  0x12   :  { %322 = vmatprep.subr.msk.mxu0 %vm77_vm0, %v52_v1  ;;  %360 = vmatprep.subr.msk.mxu1 %vm77_vm0, %v52_v1  ;;  %v55_v6 = vld [vmem:[%s584_s2 + $0x10] sm:$0xff]  ;;  %v53_v7 = vld [vmem:[%s584_s2] sm:$0xff]  ;;  %v56_v9 = vld [vmem:[%s584_s2 + $0x18] sm:$0xff]  ;;  %s272_s13 = sshll.u32 %s455_s12, 4  ;;  %s273_s13 = int_to_ptr.vmem [resolvable:$true] %s272_s13 }
  0x13   :  { %323 = vmatpush3.xpose.msk.msra.mxu0 %vm77_vm0, %v52_v1  ;;  %376 = vmatpush3.xpose.msk.msra.mxu1 %vm77_vm0, %v52_v1  ;;  %v49_v8 = vld [vmem:[#allocation3 + $0x60] sm:$0xff]  ;;  %v54_v10 = vld [vmem:[%s584_s2 + $0x8] sm:$0xff]  ;;  %v48_v11 = vld [vmem:[#allocation3 + $0x58] sm:$0xff]  ;;  %s426_s14 = scalar_lea.vmem %s273_s13, 16  ;;  %s430_s15 = scalar_lea.vmem %s273_s13, 32 }
  0x14   :  { %324 = vmatprep.subr.msk.mxu0 %vm77_vm0, %v51_v2  ;;  %361 = vmatprep.subr.msk.mxu1 %vm77_vm0, %v51_v2  ;;  %v47_v12 = vld [vmem:[#allocation3 + $0x50] sm:$0xff]  ;;  %v46_v14 = vld [vmem:[#allocation3 + $0x48] sm:$0xff]  ;;  %v45_v15 = vld [vmem:[#allocation3 + $0x40] sm:$0xff]  ;;  %p427_p5 = scmp.ne.s32.totalorder %s273_s13, %s426_s14  ;;  %p431_p6 = scmp.lt.s32.totalorder %s273_s13, %s273_s13 }
  0x15   :  { %354 = vmatprep.mubr.msk.f32.mxu0 %vm77_vm0, %v33_v4  ;;  %357 = vmatprep.mubr.msk.f32.mxu1 %vm77_vm0, %v35_v5  ;;  %v44_v16 = vld [vmem:[#allocation3 + $0x38] sm:$0xff]  ;;  %v43_v17 = vld [vmem:[#allocation3 + $0x30] sm:$0xff]  ;;  %v42_v18 = vld [vmem:[#allocation3 + $0x28] sm:$0xff]  ;;  %p432_p7 = scmp.lt.s32.totalorder %s430_s15, %s426_s14 }
  0x16   :  { %69 = vperm.xlu1 %399, %v55_v6   ;;  %59 = vperm.xlu0 %398, %v53_v7   ;;  %v41_v19 = vld [vmem:[#allocation3 + $0x20] sm:$0xff]  ;;  %v40_v20 = vld [vmem:[#allocation3 + $0x18] sm:$0xff]  ;;  %v39_v21 = vld [vmem:[#allocation3 + $0x10] sm:$0xff] }
  0x17   :  { %325 = vmatpush3.xpose.msk.msra.mxu0 %vm77_vm0, %v51_v2  ;;  %377 = vmatpush3.xpose.msk.msra.mxu1 %vm77_vm0, %v51_v2  ;;  %v38_v22 = vld [vmem:[#allocation3 + $0x8] sm:$0xff]  ;;  %v37_v23 = vld [vmem:[#allocation3] sm:$0xff]  ;;  %v36_v25 = vld [vmem:[%s583_s1 + $0x18] sm:$0xff]  ;;  %p433_p8 = por %p432_p7, %p431_p6 }
  0x18   :  { %326 = vmatprep.subr.msk.mxu0 %vm77_vm0, %v50_v3  ;;  %362 = vmatprep.subr.msk.mxu1 %vm77_vm0, %v50_v3  ;;  %v34_v24 = vld [vmem:[%s583_s1 + $0x8] sm:$0xff] }
  0x19   :  { %p434_p9 = pnand %p433_p8, %p427_p5 }
  0x1a   :  { %74 = vperm.xlu1 %399, %v56_v9   ;;  %64 = vperm.xlu0 %398, %v54_v10  }
  0x1b   :  { %327 = vmatpush3.xpose.msk.msra.mxu0 %vm77_vm0, %v50_v3  ;;  %378 = vmatpush3.xpose.msk.msra.mxu1 %vm77_vm0, %v50_v3 }
  0x1c   :  { %328 = vmatprep.subr.msk.mxu0 %vm77_vm0, %v49_v8  ;;  %363 = vmatprep.subr.msk.mxu1 %vm77_vm0, %v49_v8 }
  0x1e   :  { %401 = vset.pattern.permute.xlu1 %v454_v13  ;;  %400 = vset.pattern.permute.xlu0 %v454_v13 }
  0x1f   :  { %329 = vmatpush3.xpose.msk.msra.mxu0 %vm77_vm0, %v49_v8  ;;  %379 = vmatpush3.xpose.msk.msra.mxu1 %vm77_vm0, %v49_v8 }
  0x20   :  { %330 = vmatprep.subr.msk.mxu0 %vm77_vm0, %v48_v11  ;;  %364 = vmatprep.subr.msk.mxu1 %vm77_vm0, %v48_v11 }
  0x21   :  { %232 = vperm.xlu1 %401, %v54_v10   ;;  %228 = vperm.xlu0 %400, %v53_v7  }
  0x23   :  { %331 = vmatpush3.xpose.msk.msra.mxu0 %vm77_vm0, %v48_v11  ;;  %380 = vmatpush3.xpose.msk.msra.mxu1 %vm77_vm0, %v48_v11 }
  0x24   :  { %332 = vmatprep.subr.msk.mxu0 %vm77_vm0, %v47_v12  ;;  %365 = vmatprep.subr.msk.mxu1 %vm77_vm0, %v47_v12 }
  0x25   :  { %236 = vperm.xlu1 %401, %v55_v6   ;;  %240 = vperm.xlu0 %400, %v56_v9  }
  0x27   :  { %333 = vmatpush3.xpose.msk.msra.mxu0 %vm77_vm0, %v47_v12  ;;  %381 = vmatpush3.xpose.msk.msra.mxu1 %vm77_vm0, %v47_v12 }
  0x28   :  { %334 = vmatprep.subr.msk.mxu0 %vm77_vm0, %v46_v14  ;;  %366 = vmatprep.subr.msk.mxu1 %vm77_vm0, %v46_v14 }
  0x2b   :  { %335 = vmatpush3.xpose.msk.msra.mxu0 %vm77_vm0, %v46_v14  ;;  %382 = vmatpush3.xpose.msk.msra.mxu1 %vm77_vm0, %v46_v14 }
  0x2c   :  { %336 = vmatprep.subr.msk.mxu0 %vm77_vm0, %v45_v15  ;;  %367 = vmatprep.subr.msk.mxu1 %vm77_vm0, %v45_v15 }
  0x2f   :  { %337 = vmatpush3.xpose.msk.msra.mxu0 %vm77_vm0, %v45_v15  ;;  %383 = vmatpush3.xpose.msk.msra.mxu1 %vm77_vm0, %v45_v15 }
  0x30   :  { %338 = vmatprep.subr.msk.mxu0 %vm77_vm0, %v44_v16  ;;  %368 = vmatprep.subr.msk.mxu1 %vm77_vm0, %v44_v16 }
  0x33   :  { %339 = vmatpush3.xpose.msk.msra.mxu0 %vm77_vm0, %v44_v16  ;;  %384 = vmatpush3.xpose.msk.msra.mxu1 %vm77_vm0, %v44_v16 }
  0x34   :  { %340 = vmatprep.subr.msk.mxu0 %vm77_vm0, %v43_v17  ;;  %369 = vmatprep.subr.msk.mxu1 %vm77_vm0, %v43_v17 }
  0x37   :  { %341 = vmatpush3.xpose.msk.msra.mxu0 %vm77_vm0, %v43_v17  ;;  %385 = vmatpush3.xpose.msk.msra.mxu1 %vm77_vm0, %v43_v17 }
  0x38   :  { %342 = vmatprep.subr.msk.mxu0 %vm77_vm0, %v42_v18  ;;  %370 = vmatprep.subr.msk.mxu1 %vm77_vm0, %v42_v18 }
  0x3b   :  { %343 = vmatpush3.xpose.msk.msra.mxu0 %vm77_vm0, %v42_v18  ;;  %386 = vmatpush3.xpose.msk.msra.mxu1 %vm77_vm0, %v42_v18 }
  0x3c   :  { %344 = vmatprep.subr.msk.mxu0 %vm77_vm0, %v41_v19  ;;  %371 = vmatprep.subr.msk.mxu1 %vm77_vm0, %v41_v19 }
  0x3f   :  { %345 = vmatpush3.xpose.msk.msra.mxu0 %vm77_vm0, %v41_v19  ;;  %387 = vmatpush3.xpose.msk.msra.mxu1 %vm77_vm0, %v41_v19 }
  0x40   :  { %346 = vmatprep.subr.msk.mxu0 %vm77_vm0, %v40_v20  ;;  %372 = vmatprep.subr.msk.mxu1 %vm77_vm0, %v40_v20 }
  0x43   :  { %347 = vmatpush3.xpose.msk.msra.mxu0 %vm77_vm0, %v40_v20  ;;  %388 = vmatpush3.xpose.msk.msra.mxu1 %vm77_vm0, %v40_v20 }
  0x44   :  { %348 = vmatprep.subr.msk.mxu0 %vm77_vm0, %v39_v21  ;;  %373 = vmatprep.subr.msk.mxu1 %vm77_vm0, %v39_v21 }
  0x47   :  { %349 = vmatpush3.xpose.msk.msra.mxu0 %vm77_vm0, %v39_v21  ;;  %389 = vmatpush3.xpose.msk.msra.mxu1 %vm77_vm0, %v39_v21 }
  0x48   :  { %350 = vmatprep.subr.msk.mxu0 %vm77_vm0, %v38_v22  ;;  %374 = vmatprep.subr.msk.mxu1 %vm77_vm0, %v38_v22 }
  0x4b   :  { %351 = vmatpush3.xpose.msk.msra.mxu0 %vm77_vm0, %v38_v22  ;;  %390 = vmatpush3.xpose.msk.msra.mxu1 %vm77_vm0, %v38_v22 }
  0x4c   :  { %352 = vmatprep.subr.msk.mxu0 %vm77_vm0, %v37_v23  ;;  %375 = vmatprep.subr.msk.mxu1 %vm77_vm0, %v37_v23 }
  0x4f   :  { %353 = vmatpush3.xpose.msk.msra.mxu0 %vm77_vm0, %v37_v23  ;;  %391 = vmatpush3.xpose.msk.msra.mxu1 %vm77_vm0, %v37_v23 }
  0x52   :  { %355 = vmatmul.mubr.msk.f32.vlgmr.msra.gmra.mxu0 %vm77_vm0, %v34_v24  ;;  %358 = vmatmul.mubr.msk.f32.vlgmr.msra.gmra.mxu1 %vm77_vm0, %v36_v25 }
  0x91   :  { %v70_v26 = vpop.permute.xlu1 %69  ;;  %v60_v27 = vpop.permute.xlu0 %59 }
  0x95   :  { %v75_v28 = vpop.permute.xlu1 %74  ;;  %v65_v29 = vpop.permute.xlu0 %64 }
  0x9c   :  { %v233_v32 = vpop.permute.xlu1 %232  ;;  %v229_v33 = vpop.permute.xlu0 %228 }
  0xa0   :  { %v237_v46 = vpop.permute.xlu1 %236  ;;  %v241_v47 = vpop.permute.xlu0 %240 }
 0x112   :  { %v356_v30 = vpop.f32.mrf.mxu0  ;;  %v359_v31 = vpop.f32.mrf.mxu1 }
 0x113   :  { %v210_v34 = vadd.f32 %v356_v30, %v65_v29  ;;  %v220_v38 = vadd.f32 %v359_v31, %v75_v28 }
 0x114   :  { %v204_v35 = vpop.f32.mrf.mxu0  ;;  %v214_v36 = vpop.f32.mrf.mxu1 }
 0x115   :  { %v224_v37 = vmax.f32 %v210_v34, 0.0  ;;  %v205_v39 = vadd.f32 %v204_v35, %v60_v27  ;;  %v215_v40 = vadd.f32 %v214_v36, %v70_v26  ;;  %v226_v44 = vmax.f32 %v220_v38, 0.0 }
 0x117   :  { %v223_v41 = vmax.f32 %v205_v39, 0.0  ;;  %v225_v42 = vmax.f32 %v215_v40, 0.0  ;;  %v244_v43 = vmul.f32 %v233_v32, %v224_v37  ;;  %v246_v51 = vmul.f32 %v241_v47, %v226_v44 }
 0x119   :  { %v243_v45 = vmul.f32 %v229_v33, %v223_v41  ;;  %v245_v48 = vmul.f32 %v237_v46, %v225_v42 }
 0x11b   :  { %v247_v49 = vadd.f32 %v244_v43, %v243_v45 }
 0x11d   :  { %v248_v50 = vadd.f32 %v247_v49, %v245_v48 }
 0x11f   :  { %v249_v52 = vadd.f32 %v248_v50, %v246_v51 }
 0x121   :  { %v250_v53 = vrot.slane %v249_v52, 4 }
 0x123   :  { %v251_v54 = vadd.f32 %v250_v53, %v249_v52 }
 0x125   :  { %v252_v55 = vrot.slane %v251_v54, 2 }
 0x127   :  { %v253_v56 = vadd.f32 %v252_v55, %v251_v54 }
 0x129   :  { %v254_v57 = vrot.slane %v253_v56, 1 }
 0x12b   :  { %v255_v59 = vadd.f32 %v254_v57, %v253_v56 }
 0x12d   :  { %v258_v60 = vadd.f32 %v257_v58, %v255_v59 }
 0x12f   :  { %v301_v61 = vmul.f32 -1.442695, %v258_v60 }
 0x131   :  { %402 = vpow2.f32 %v301_v61 }
 0x13e   :  { %v403_v62 = vpop.eup %402 }
 0x13f   :  { %v262_v63 = vadd.f32 1.0, %v403_v62 }
 0x141   :  { %404 = vrcp.f32 %v262_v63 }
 0x14e   :  { %v405_v0 = vpop.eup %404 }
 0x14f   :  { %265 = vst [vmem:[#allocation6] sm:$0x1] %v405_v0 }
 0x150   :  { %437 = shalt.err (!%p434_p9)
}
 0x151   :  { %275 = dma.vmem_to_hbm [thread:$0]  %s273_s13, 16, %s586_s4, [#allocation5]  }
 0x152   :  { %448 = dma.done.wait [#allocation5], 16  }
 0x153   :  { %449 = vsyncadd [#allocation5], 4294967280 }
 0x154   :  { %279 = vsyncpa [#allocation4], 1 }
 0x155   :  { %280 = vsyncpa [#allocation5], 1 }

</bundles_post_ra>
